<compile_context>
chip_gen: v5e
topology: v5e:2x2
jax: 0.10.0
libtpu: 0.0.40
codegen_flags: <defaults>
</compile_context>

<pallas_src>
import functools
import math

import jax
import jax.numpy as jnp
import numpy as np
from jax import lax
from jax.experimental import pallas as pl
from jax.experimental.pallas import tpu as pltpu

# TODO(synk): nn.Dropout is identity at inference; training-mode stochastic dropout
# (pltpu.prng_seed + pltpu.prng_random_bits mask) is intentionally not applied here.
# TODO(synk): bf16 input/weight feeding (halves DMA bytes) is left out to keep the f32
# reference tolerance tight; flip wrapper dtypes if upstream tolerates it.


def _cross_attention_kernel(
    q_ref, k_ref, v_ref, mask_ref,
    wq_ref, bq_ref, wk_ref, bk_ref, wv_ref, bv_ref, wc_ref, bc_ref,
    gamma_ref, beta_ref,
    out_ref,
    *, n_head: int, residual: bool, eps: float,
):
    bt, nq, q_dim = q_ref.shape          # batch tile
    _, nk, k_dim = k_ref.shape
    d_model = wq_ref.shape[1]
    d_head = d_model // n_head

    qf = q_ref[...].reshape(bt * nq, q_dim)          # leading-dim merges: free reshapes
    kf = k_ref[...].reshape(bt * nk, k_dim)
    vf = v_ref[...].reshape(bt * nk, k_dim)

    # Linear projections over the whole batch tile (one MXU matmul each, M = bt*n rows).
    # The 1/sqrt(d_head) attention scale is pre-folded into wq/bq by the wrapper.
    qp = jnp.dot(qf, wq_ref[...], preferred_element_type=jnp.float32) + bq_ref[0]
    kp = jnp.dot(kf, wk_ref[...], preferred_element_type=jnp.float32) + bk_ref[0]
    vp = jnp.dot(vf, wv_ref[...], preferred_element_type=jnp.float32) + bv_ref[0]

    qp3 = qp.reshape(bt, nq, d_model)
    kp3 = kp.reshape(bt, nk, d_model)
    vp3 = vp.reshape(bt, nk, d_model)

    # Additive mask bias (mask is 0/1): replaces a per-head compare+select.
    # NOTE: for a fully-masked query row this yields softmax of the shifted raw scores
    # while the reference yields a uniform distribution; identical whenever at least one
    # key is visible (exp underflows either way).
    bias = (mask_ref[...] - 1.0) * 10000.0           # (bt, nq, nk)

    # Per-head QK^T scores, stacked along the query (sublane) axis so the softmax
    # (max / exp / sum / reciprocal) launches once for all heads instead of n_head times.
    scores = []
    for h in range(n_head):                          # static unroll over heads
        hs = slice(h * d_head, (h + 1) * d_head)
        s = jnp.einsum("bqd,bkd->bqk", qp3[:, :, hs], kp3[:, :, hs],
                       preferred_element_type=jnp.float32) + bias
        scores.append(s)
    s_all = jnp.concatenate(scores, axis=1)          # (bt, n_head*nq, nk) sublane concat

    # Numerically-stable softmax along keys, once for all heads.  The approximate
    # reciprocal issues on the otherwise-idle EUP slot.
    m = jnp.max(s_all, axis=-1, keepdims=True)
    p = jnp.exp(s_all - m)
    p = p * pl.reciprocal(jnp.sum(p, axis=-1, keepdims=True), approx=True)

    # Per-head attention*V accumulated straight into the output projection:
    #   x += (p_h @ v_h) @ Wc[h*d_head:(h+1)*d_head, :]
    # This removes the lane-axis concat of head outputs (vreg relayout) entirely.
    wc = wc_ref[...]                                 # (d_model, q_dim)
    x = jnp.zeros((bt * nq, q_dim), dtype=jnp.float32)
    for h in range(n_head):
        hs = slice(h * d_head, (h + 1) * d_head)
        p_h = p[:, h * nq:(h + 1) * nq, :]           # (bt, nq, nk) sublane slice
        ctx_h = jnp.einsum("bqk,bkd->bqd", p_h, vp3[:, :, hs],
                           preferred_element_type=jnp.float32)
        x = x + jnp.dot(ctx_h.reshape(bt * nq, d_head), wc[hs, :],
                        preferred_element_type=jnp.float32)
    x = x + bc_ref[0]
    if residual:
        x = x + qf

    # LayerNorm over the feature axis; exact rsqrt still issues on the EUP slot.
    mean = jnp.mean(x, axis=-1, keepdims=True)
    var = jnp.mean((x - mean) ** 2, axis=-1, keepdims=True)
    normed = (x - mean) * lax.rsqrt(var + eps)
    out_ref[...] = normed * gamma_ref[0] + beta_ref[0]   # 2-D lane-dense store


def _tpu_hw_info():
    """Best-effort (num_tensorcores_per_chip, vmem_capacity_bytes) with safe fallbacks."""
    num_tc, vmem = 1, 32 * 1024 * 1024               # conservative scoped-VMEM default
    try:
        info = pltpu.get_tpu_info()
        vmem = int(getattr(info, "vmem_capacity_bytes", vmem))
        for attr in ("num_tensorcores", "tensorcores_per_chip", "num_cores", "core_count"):
            n = getattr(info, attr, None)
            if isinstance(n, int) and 1 <= n <= 8:
                num_tc = n
                break
    except Exception:
        pass
    try:
        kind = jax.devices()[0].device_kind.lower()
        if "v7" in kind:                             # v7x: 2 TensorCores, 64 MiB VMEM/TC
            num_tc = max(num_tc, 2)
            vmem = min(vmem, 64 * 1024 * 1024)
    except Exception:
        pass
    return num_tc, vmem


def _block_vmem_bytes(bt, nq, nk, q_dim, k_dim, d_model, n_head):
    """Rough f32 VMEM footprint of one grid step (double-buffered blocks + temporaries)."""
    io_blocks = bt * (nq * q_dim + 2 * nk * k_dim + nq * nk + nq * q_dim)
    weights = (q_dim * d_model + 2 * k_dim * d_model + d_model * q_dim
               + 4 * d_model + 3 * q_dim)
    temps = bt * (nq * d_model + 2 * nk * d_model        # qp / kp / vp
                  + 2 * n_head * nq * nk                 # stacked scores + softmax
                  + 2 * nq * q_dim)                      # x, out
    return 4 * (2 * (io_blocks + weights) + temps)


def _default_batch_tile(bs, nq, nk, q_dim, k_dim, d_model, n_head, num_tc, vmem_bytes):
    budget = int(0.75 * vmem_bytes)
    # Prefer ONE grid step (max matmul M, no per-step overhead).  Split only when there
    # are multiple TensorCores (v7x) AND each half still feeds >= 256 rows per projection.
    target = bs
    if num_tc > 1 and bs % num_tc == 0 and (bs // num_tc) * nq >= 256:
        target = bs // num_tc
    # Cap against the VMEM budget: largest divisor of bs that is <= target and fits.
    for bt in sorted((d for d in range(1, bs + 1) if bs % d == 0), reverse=True):
        if bt <= target and _block_vmem_bytes(bt, nq, nk, q_dim, k_dim, d_model,
                                              n_head) <= budget:
            return bt
    return 1


def cross_attention_layer(q, k, v, params, mask=None, *, n_head,
                          residual=True, eps=1e-12, batch_tile=None):
    bs, nq, q_dim = q.shape
    _, nk, k_dim = k.shape
    d_model = params["wq"].shape[1]
    d_head = d_model // n_head

    if mask is None:
        mask = jnp.ones((bs, nq, nk), dtype=jnp.float32)
    mask = mask.astype(jnp.float32)                  # explicit cast for bool/int masks

    num_tc, vmem_bytes = _tpu_hw_info()
    if batch_tile is None:
        batch_tile = _default_batch_tile(bs, nq, nk, q_dim, k_dim, d_model, n_head,
                                         num_tc, vmem_bytes)
    assert bs % batch_tile == 0, "bs must be divisible by batch_tile"
    num_steps = bs // batch_tile

    # Raise the scoped-VMEM limit only when the block footprint actually needs it.
    block_bytes = _block_vmem_bytes(batch_tile, nq, nk, q_dim, k_dim, d_model, n_head)
    vmem_limit = None
    if block_bytes > 24 * 1024 * 1024:
        vmem_limit = min(int(block_bytes * 1.5), vmem_bytes)

    # Parameter prep (tiny, one-time): fold the attention scale into the Q projection,
    # present biases / LN params as (1, F) 2-D slabs for TPU-friendly layout.
    scale = 1.0 / math.sqrt(d_head)
    wq = params["wq"] * scale
    bq = (params["bq"] * scale).reshape(1, -1)
    bk = params["bk"].reshape(1, -1)
    bv = params["bv"].reshape(1, -1)
    bc = params["bc"].reshape(1, -1)
    gamma = params["gamma"].reshape(1, -1)
    beta = params["beta"].reshape(1, -1)

    batch_spec = lambda shape: pl.BlockSpec((batch_tile,) + shape, lambda b: (b, 0, 0))
    # Constant operands (weights/biases/LN params).  NOTE: when num_steps > 1 at large
    # d_model these could be single-buffered (pipeline_mode) to save VMEM on v7x;
    # negligible at these sizes so the default is kept.
    full_spec = lambda shape: pl.BlockSpec(shape, lambda b: (0,) * len(shape))

    kernel = functools.partial(
        _cross_attention_kernel, n_head=n_head, residual=residual, eps=eps)

    # Advisory cost hint for the XLA scheduler.
    flops = 2 * bs * (nq * q_dim * d_model + 2 * nk * k_dim * d_model
                      + 2 * nq * nk * d_model + nq * d_model * q_dim)
    transcendentals = bs * (n_head * nq * nk + n_head * nq + nq)   # exp + recip + rsqrt
    bytes_accessed = 4 * (int(q.size) + int(k.size) + int(v.size) + int(mask.size)
                          + bs * nq * q_dim + q_dim * d_model + 2 * k_dim * d_model
                          + d_model * q_dim + 4 * d_model + 3 * q_dim)

    out2d = pl.pallas_call(
        kernel,
        out_shape=jax.ShapeDtypeStruct((bs * nq, q_dim), jnp.float32),
        grid_spec=pltpu.PrefetchScalarGridSpec(
            num_scalar_prefetch=0,
            grid=(num_steps,),
            in_specs=[
                batch_spec((nq, q_dim)),      # q
                batch_spec((nk, k_dim)),      # k
                batch_spec((nk, k_dim)),      # v
                batch_spec((nq, nk)),         # mask
                full_spec((q_dim, d_model)),  # wq (pre-scaled by 1/sqrt(d_head))
                full_spec((1, d_model)),      # bq (pre-scaled)
                full_spec((k_dim, d_model)),  # wk
                full_spec((1, d_model)),      # bk
                full_spec((k_dim, d_model)),  # wv
                full_spec((1, d_model)),      # bv
                full_spec((d_model, q_dim)),  # wc
                full_spec((1, q_dim)),        # bc
                full_spec((1, q_dim)),        # gamma
                full_spec((1, q_dim)),        # beta
            ],
            out_specs=pl.BlockSpec((batch_tile * nq, q_dim), lambda b: (b, 0)),
        ),
        compiler_params=pltpu.CompilerParams(
            dimension_semantics=("parallel",),
            vmem_limit_bytes=vmem_limit),
        cost_estimate=pl.CostEstimate(flops=flops, transcendentals=transcendentals,
                                      bytes_accessed=bytes_accessed),
    )(q, k, v, mask, wq, bq, params["wk"], bk, params["wv"], bv,
      params["wc"], bc, gamma, beta)

    return out2d.reshape(bs, nq, q_dim)


def _reference(q, k, v, mask, params, *, n_head, residual=True, eps=1e-12):
    """Pure-JAX reference mirroring the PyTorch forward pass."""
    qp = q @ params["wq"] + params["bq"]
    kp = k @ params["wk"] + params["bk"]
    vp = v @ params["wv"] + params["bv"]
    bs, nq, d_model = qp.shape
    nk = kp.shape[1]
    d_head = d_model // n_head

    def split(x, n):
        return x.reshape(bs, n, n_head, d_head).transpose(0, 2, 1, 3)

    qh, kh, vh = split(qp, nq), split(kp, nk), split(vp, nk)
    score = jnp.einsum("bhqd,bhkd->bhqk", qh, kh) / math.sqrt(d_head)
    score = jnp.where(mask[:, None, :, :] == 0, -10000.0, score)
    attn = jax.nn.softmax(score, axis=-1)
    out = jnp.einsum("bhqk,bhkd->bhqd", attn, vh)
    out = out.transpose(0, 2, 1, 3).reshape(bs, nq, d_model)
    x = out @ params["wc"] + params["bc"]
    if residual:
        x = x + q
    mean = jnp.mean(x, axis=-1, keepdims=True)
    var = jnp.mean((x - mean) ** 2, axis=-1, keepdims=True)
    return (x - mean) / jnp.sqrt(var + eps) * params["gamma"] + params["beta"]


if __name__ == "__main__":
    # Small shapes consistent with the module: q,k,v are (bs, n_img, feature_dim)
    bs, nq, nk = 2, 8, 16
    q_dim, k_dim, d_model, n_head = 32, 16, 32, 4

    key = jax.random.PRNGKey(0)
    ks = jax.random.split(key, 12)

    q = jax.random.normal(ks[0], (bs, nq, q_dim), jnp.float32)
    k = jax.random.normal(ks[1], (bs, nk, k_dim), jnp.float32)
    v = jax.random.normal(ks[2], (bs, nk, k_dim), jnp.float32)
    # binary mask (bs, n_img, H*W): 0 -> masked out
    mask = (jax.random.uniform(ks[3], (bs, nq, nk)) > 0.2).astype(jnp.float32)

    init = lambda kk, shape: 0.05 * jax.random.normal(kk, shape, jnp.float32)
    params = {
        "wq": init(ks[4], (q_dim, d_model)), "bq": init(ks[5], (d_model,)),
        "wk": init(ks[6], (k_dim, d_model)), "bk": init(ks[7], (d_model,)),
        "wv": init(ks[8], (k_dim, d_model)), "bv": init(ks[9], (d_model,)),
        "wc": init(ks[10], (d_model, q_dim)), "bc": init(ks[11], (q_dim,)),
        "gamma": jnp.ones((q_dim,), jnp.float32),
        "beta": jnp.zeros((q_dim,), jnp.float32),
    }

    out = cross_attention_layer(q, k, v, params, mask=mask, n_head=n_head, residual=True)
    out = jax.block_until_ready(out)

    ref = _reference(q, k, v, mask, params, n_head=n_head, residual=True)
    # Tolerance loosened slightly (1e-4 -> 1e-3) for the EUP approximate reciprocal in
    # the softmax; outputs are O(1) after LayerNorm so this remains a tight check.
    np.testing.assert_allclose(np.asarray(out), np.asarray(ref), rtol=1e-3, atol=1e-3)

    print("KERNEL_OK")
</pallas_src>

<mosaic_0001>
module attributes {stable_mosaic.version = 11 : i64} {
  func.func @_cross_attention_kernel(%arg0: i32, %arg1: memref<2x8x32xf32, #tpu.memory_space<vmem>>, %arg2: memref<2x16x16xf32, #tpu.memory_space<vmem>>, %arg3: memref<2x16x16xf32, #tpu.memory_space<vmem>>, %arg4: memref<2x8x16xf32, #tpu.memory_space<vmem>>, %arg5: memref<32x32xf32, #tpu.memory_space<vmem>>, %arg6: memref<1x32xf32, #tpu.memory_space<vmem>>, %arg7: memref<16x32xf32, #tpu.memory_space<vmem>>, %arg8: memref<1x32xf32, #tpu.memory_space<vmem>>, %arg9: memref<16x32xf32, #tpu.memory_space<vmem>>, %arg10: memref<1x32xf32, #tpu.memory_space<vmem>>, %arg11: memref<32x32xf32, #tpu.memory_space<vmem>>, %arg12: memref<1x32xf32, #tpu.memory_space<vmem>>, %arg13: memref<1x32xf32, #tpu.memory_space<vmem>>, %arg14: memref<1x32xf32, #tpu.memory_space<vmem>>, %arg15: memref<16x32xf32, #tpu.memory_space<vmem>>) attributes {dimension_semantics = [#tpu.dimension_semantics<parallel>], iteration_bounds = array<i64: 1>, scalar_prefetch = 0 : i64, scratch_operands = 0 : i64, tpu.core_type = #tpu.core_type<tc>, window_params = [{transform_indices = @transform_0, window_bounds = array<i64: 2, 8, 32>}, {transform_indices = @transform_1, window_bounds = array<i64: 2, 16, 16>}, {transform_indices = @transform_2, window_bounds = array<i64: 2, 16, 16>}, {transform_indices = @transform_3, window_bounds = array<i64: 2, 8, 16>}, {pipeline_mode = #tpu.pipeline_mode<synchronous>, transform_indices = @transform_4, window_bounds = array<i64: 32, 32>}, {pipeline_mode = #tpu.pipeline_mode<synchronous>, transform_indices = @transform_5, window_bounds = array<i64: 1, 32>}, {pipeline_mode = #tpu.pipeline_mode<synchronous>, transform_indices = @transform_6, window_bounds = array<i64: 16, 32>}, {pipeline_mode = #tpu.pipeline_mode<synchronous>, transform_indices = @transform_7, window_bounds = array<i64: 1, 32>}, {pipeline_mode = #tpu.pipeline_mode<synchronous>, transform_indices = @transform_8, window_bounds = array<i64: 16, 32>}, {pipeline_mode = #tpu.pipeline_mode<synchronous>, transform_indices = @transform_9, window_bounds = array<i64: 1, 32>}, {pipeline_mode = #tpu.pipeline_mode<synchronous>, transform_indices = @transform_10, window_bounds = array<i64: 32, 32>}, {pipeline_mode = #tpu.pipeline_mode<synchronous>, transform_indices = @transform_11, window_bounds = array<i64: 1, 32>}, {pipeline_mode = #tpu.pipeline_mode<synchronous>, transform_indices = @transform_12, window_bounds = array<i64: 1, 32>}, {pipeline_mode = #tpu.pipeline_mode<synchronous>, transform_indices = @transform_13, window_bounds = array<i64: 1, 32>}, {transform_indices = @transform_14, window_bounds = array<i64: 16, 32>}]} {
    %c0 = arith.constant 0 : index
    %c0_0 = arith.constant 0 : index
    %c0_1 = arith.constant 0 : index
    %0 = vector.load %arg1[%c0, %c0_0, %c0_1] : memref<2x8x32xf32, #tpu.memory_space<vmem>>, vector<2x8x32xf32>
    %1 = vector.shape_cast %0 : vector<2x8x32xf32> to vector<16x32xf32>
    %c0_2 = arith.constant 0 : index
    %c0_3 = arith.constant 0 : index
    %c0_4 = arith.constant 0 : index
    %2 = vector.load %arg2[%c0_2, %c0_3, %c0_4] : memref<2x16x16xf32, #tpu.memory_space<vmem>>, vector<2x16x16xf32>
    %3 = vector.shape_cast %2 : vector<2x16x16xf32> to vector<32x16xf32>
    %c0_5 = arith.constant 0 : index
    %c0_6 = arith.constant 0 : index
    %c0_7 = arith.constant 0 : index
    %4 = vector.load %arg3[%c0_5, %c0_6, %c0_7] : memref<2x16x16xf32, #tpu.memory_space<vmem>>, vector<2x16x16xf32>
    %5 = vector.shape_cast %4 : vector<2x16x16xf32> to vector<32x16xf32>
    %c0_8 = arith.constant 0 : index
    %c0_9 = arith.constant 0 : index
    %6 = vector.load %arg5[%c0_8, %c0_9] : memref<32x32xf32, #tpu.memory_space<vmem>>, vector<32x32xf32>
    %cst = arith.constant dense<0.000000e+00> : vector<16x32xf32>
    %7 = tpu.matmul %1, %6, %cst {dimension_numbers = #tpu.dot_dimension_numbers<[1], [0], [0], [1], [0, 0, 1, 1], [], []>} : vector<16x32xf32>, vector<32x32xf32>, vector<16x32xf32> -> vector<16x32xf32>
    %c0_10 = arith.constant 0 : index
    %c0_11 = arith.constant 0 : index
    %8 = vector.load %arg6[%c0_10, %c0_11] : memref<1x32xf32, #tpu.memory_space<vmem>>, vector<1x32xf32>
    %9 = vector.shape_cast %8 : vector<1x32xf32> to vector<32xf32>
    %10 = vector.shape_cast %9 : vector<32xf32> to vector<1x32xf32>
    %11 = vector.broadcast %10 : vector<1x32xf32> to vector<16x32xf32>
    %12 = arith.addf %7, %11 : vector<16x32xf32>
    %c0_12 = arith.constant 0 : index
    %c0_13 = arith.constant 0 : index
    %13 = vector.load %arg7[%c0_12, %c0_13] : memref<16x32xf32, #tpu.memory_space<vmem>>, vector<16x32xf32>
    %cst_14 = arith.constant dense<0.000000e+00> : vector<32x32xf32>
    %14 = tpu.matmul %3, %13, %cst_14 {dimension_numbers = #tpu.dot_dimension_numbers<[1], [0], [0], [1], [0, 0, 1, 1], [], []>} : vector<32x16xf32>, vector<16x32xf32>, vector<32x32xf32> -> vector<32x32xf32>
    %c0_15 = arith.constant 0 : index
    %c0_16 = arith.constant 0 : index
    %15 = vector.load %arg8[%c0_15, %c0_16] : memref<1x32xf32, #tpu.memory_space<vmem>>, vector<1x32xf32>
    %16 = vector.shape_cast %15 : vector<1x32xf32> to vector<32xf32>
    %17 = vector.shape_cast %16 : vector<32xf32> to vector<1x32xf32>
    %18 = vector.broadcast %17 : vector<1x32xf32> to vector<32x32xf32>
    %19 = arith.addf %14, %18 : vector<32x32xf32>
    %c0_17 = arith.constant 0 : index
    %c0_18 = arith.constant 0 : index
    %20 = vector.load %arg9[%c0_17, %c0_18] : memref<16x32xf32, #tpu.memory_space<vmem>>, vector<16x32xf32>
    %cst_19 = arith.constant dense<0.000000e+00> : vector<32x32xf32>
    %21 = tpu.matmul %5, %20, %cst_19 {dimension_numbers = #tpu.dot_dimension_numbers<[1], [0], [0], [1], [0, 0, 1, 1], [], []>} : vector<32x16xf32>, vector<16x32xf32>, vector<32x32xf32> -> vector<32x32xf32>
    %c0_20 = arith.constant 0 : index
    %c0_21 = arith.constant 0 : index
    %22 = vector.load %arg10[%c0_20, %c0_21] : memref<1x32xf32, #tpu.memory_space<vmem>>, vector<1x32xf32>
    %23 = vector.shape_cast %22 : vector<1x32xf32> to vector<32xf32>
    %24 = vector.shape_cast %23 : vector<32xf32> to vector<1x32xf32>
    %25 = vector.broadcast %24 : vector<1x32xf32> to vector<32x32xf32>
    %26 = arith.addf %21, %25 : vector<32x32xf32>
    %27 = vector.shape_cast %12 : vector<16x32xf32> to vector<2x8x32xf32>
    %28 = vector.shape_cast %19 : vector<32x32xf32> to vector<2x16x32xf32>
    %29 = vector.shape_cast %26 : vector<32x32xf32> to vector<2x16x32xf32>
    %c0_22 = arith.constant 0 : index
    %c0_23 = arith.constant 0 : index
    %c0_24 = arith.constant 0 : index
    %30 = vector.load %arg4[%c0_22, %c0_23, %c0_24] : memref<2x8x16xf32, #tpu.memory_space<vmem>>, vector<2x8x16xf32>
    %cst_25 = arith.constant 1.000000e+00 : f32
    %31 = vector.broadcast %cst_25 : f32 to vector<2x8x16xf32>
    %32 = arith.subf %30, %31 : vector<2x8x16xf32>
    %cst_26 = arith.constant 1.000000e+04 : f32
    %33 = vector.broadcast %cst_26 : f32 to vector<2x8x16xf32>
    %34 = arith.mulf %32, %33 : vector<2x8x16xf32>
    %35 = vector.extract_strided_slice %27 {offsets = [0, 0, 0], sizes = [2, 8, 8], strides = [1, 1, 1]} : vector<2x8x32xf32> to vector<2x8x8xf32>
    %36 = vector.extract_strided_slice %28 {offsets = [0, 0, 0], sizes = [2, 16, 8], strides = [1, 1, 1]} : vector<2x16x32xf32> to vector<2x16x8xf32>
    "tpu.trace_start"() <{level = 10 : i32, message = "bqd,bkd->bqk"}> : () -> ()
    %cst_27 = arith.constant dense<0.000000e+00> : vector<2x8x16xf32>
    %37 = tpu.matmul %35, %36, %cst_27 {dimension_numbers = #tpu.dot_dimension_numbers<[2], [2], [1], [1], [0, 0, 0, 1, 1, 1], [0], [0]>} : vector<2x8x8xf32>, vector<2x16x8xf32>, vector<2x8x16xf32> -> vector<2x8x16xf32>
    "tpu.trace_stop"() : () -> ()
    %38 = arith.addf %37, %34 : vector<2x8x16xf32>
    %39 = vector.extract_strided_slice %27 {offsets = [0, 0, 8], sizes = [2, 8, 8], strides = [1, 1, 1]} : vector<2x8x32xf32> to vector<2x8x8xf32>
    %40 = vector.extract_strided_slice %28 {offsets = [0, 0, 8], sizes = [2, 16, 8], strides = [1, 1, 1]} : vector<2x16x32xf32> to vector<2x16x8xf32>
    "tpu.trace_start"() <{level = 10 : i32, message = "bqd,bkd->bqk"}> : () -> ()
    %cst_28 = arith.constant dense<0.000000e+00> : vector<2x8x16xf32>
    %41 = tpu.matmul %39, %40, %cst_28 {dimension_numbers = #tpu.dot_dimension_numbers<[2], [2], [1], [1], [0, 0, 0, 1, 1, 1], [0], [0]>} : vector<2x8x8xf32>, vector<2x16x8xf32>, vector<2x8x16xf32> -> vector<2x8x16xf32>
    "tpu.trace_stop"() : () -> ()
    %42 = arith.addf %41, %34 : vector<2x8x16xf32>
    %43 = vector.extract_strided_slice %27 {offsets = [0, 0, 16], sizes = [2, 8, 8], strides = [1, 1, 1]} : vector<2x8x32xf32> to vector<2x8x8xf32>
    %44 = vector.extract_strided_slice %28 {offsets = [0, 0, 16], sizes = [2, 16, 8], strides = [1, 1, 1]} : vector<2x16x32xf32> to vector<2x16x8xf32>
    "tpu.trace_start"() <{level = 10 : i32, message = "bqd,bkd->bqk"}> : () -> ()
    %cst_29 = arith.constant dense<0.000000e+00> : vector<2x8x16xf32>
    %45 = tpu.matmul %43, %44, %cst_29 {dimension_numbers = #tpu.dot_dimension_numbers<[2], [2], [1], [1], [0, 0, 0, 1, 1, 1], [0], [0]>} : vector<2x8x8xf32>, vector<2x16x8xf32>, vector<2x8x16xf32> -> vector<2x8x16xf32>
    "tpu.trace_stop"() : () -> ()
    %46 = arith.addf %45, %34 : vector<2x8x16xf32>
    %47 = vector.extract_strided_slice %27 {offsets = [0, 0, 24], sizes = [2, 8, 8], strides = [1, 1, 1]} : vector<2x8x32xf32> to vector<2x8x8xf32>
    %48 = vector.extract_strided_slice %28 {offsets = [0, 0, 24], sizes = [2, 16, 8], strides = [1, 1, 1]} : vector<2x16x32xf32> to vector<2x16x8xf32>
    "tpu.trace_start"() <{level = 10 : i32, message = "bqd,bkd->bqk"}> : () -> ()
    %cst_30 = arith.constant dense<0.000000e+00> : vector<2x8x16xf32>
    %49 = tpu.matmul %47, %48, %cst_30 {dimension_numbers = #tpu.dot_dimension_numbers<[2], [2], [1], [1], [0, 0, 0, 1, 1, 1], [0], [0]>} : vector<2x8x8xf32>, vector<2x16x8xf32>, vector<2x8x16xf32> -> vector<2x8x16xf32>
    "tpu.trace_stop"() : () -> ()
    %50 = arith.addf %49, %34 : vector<2x8x16xf32>
    %51 = tpu.concatenate %38, %42, %46, %50 in 1 : vector<2x8x16xf32>, vector<2x8x16xf32>, vector<2x8x16xf32>, vector<2x8x16xf32> -> vector<2x32x16xf32>
    %cst_31 = arith.constant dense<0xFF800000> : vector<2x32xf32>
    %52 = vector.multi_reduction <maximumf>, %51, %cst_31 [2] : vector<2x32x16xf32> to vector<2x32xf32>
    %53 = vector.shape_cast %52 : vector<2x32xf32> to vector<2x32x1xf32>
    %54 = vector.broadcast %53 : vector<2x32x1xf32> to vector<2x32x16xf32>
    %55 = arith.subf %51, %54 : vector<2x32x16xf32>
    %56 = math.exp %55 : vector<2x32x16xf32>
    %cst_32 = arith.constant dense<0.000000e+00> : vector<2x32xf32>
    %57 = vector.multi_reduction <add>, %56, %cst_32 [2] : vector<2x32x16xf32> to vector<2x32xf32>
    %58 = vector.shape_cast %57 : vector<2x32xf32> to vector<2x32x1xf32>
    %59 = tpu.reciprocal %58 {approx = true} : vector<2x32x1xf32> -> vector<2x32x1xf32>
    %60 = vector.broadcast %59 : vector<2x32x1xf32> to vector<2x32x16xf32>
    %61 = arith.mulf %56, %60 : vector<2x32x16xf32>
    %c0_33 = arith.constant 0 : index
    %c0_34 = arith.constant 0 : index
    %62 = vector.load %arg11[%c0_33, %c0_34] : memref<32x32xf32, #tpu.memory_space<vmem>>, vector<32x32xf32>
    %cst_35 = arith.constant 0.000000e+00 : f32
    %63 = vector.broadcast %cst_35 : f32 to vector<16x32xf32>
    %64 = vector.extract_strided_slice %61 {offsets = [0, 0, 0], sizes = [2, 8, 16], strides = [1, 1, 1]} : vector<2x32x16xf32> to vector<2x8x16xf32>
    %65 = vector.extract_strided_slice %29 {offsets = [0, 0, 0], sizes = [2, 16, 8], strides = [1, 1, 1]} : vector<2x16x32xf32> to vector<2x16x8xf32>
    "tpu.trace_start"() <{level = 10 : i32, message = "bqk,bkd->bqd"}> : () -> ()
    %cst_36 = arith.constant dense<0.000000e+00> : vector<2x8x8xf32>
    %66 = tpu.matmul %64, %65, %cst_36 {dimension_numbers = #tpu.dot_dimension_numbers<[2], [1], [1], [2], [0, 0, 0, 1, 1, 2], [0], [0]>} : vector<2x8x16xf32>, vector<2x16x8xf32>, vector<2x8x8xf32> -> vector<2x8x8xf32>
    "tpu.trace_stop"() : () -> ()
    %67 = vector.shape_cast %66 : vector<2x8x8xf32> to vector<16x8xf32>
    %68 = vector.extract_strided_slice %62 {offsets = [0, 0], sizes = [8, 32], strides = [1, 1]} : vector<32x32xf32> to vector<8x32xf32>
    %cst_37 = arith.constant dense<0.000000e+00> : vector<16x32xf32>
    %69 = tpu.matmul %67, %68, %cst_37 {dimension_numbers = #tpu.dot_dimension_numbers<[1], [0], [0], [1], [0, 0, 1, 1], [], []>} : vector<16x8xf32>, vector<8x32xf32>, vector<16x32xf32> -> vector<16x32xf32>
    %70 = arith.addf %63, %69 : vector<16x32xf32>
    %71 = vector.extract_strided_slice %61 {offsets = [0, 8, 0], sizes = [2, 8, 16], strides = [1, 1, 1]} : vector<2x32x16xf32> to vector<2x8x16xf32>
    %72 = vector.extract_strided_slice %29 {offsets = [0, 0, 8], sizes = [2, 16, 8], strides = [1, 1, 1]} : vector<2x16x32xf32> to vector<2x16x8xf32>
    "tpu.trace_start"() <{level = 10 : i32, message = "bqk,bkd->bqd"}> : () -> ()
    %cst_38 = arith.constant dense<0.000000e+00> : vector<2x8x8xf32>
    %73 = tpu.matmul %71, %72, %cst_38 {dimension_numbers = #tpu.dot_dimension_numbers<[2], [1], [1], [2], [0, 0, 0, 1, 1, 2], [0], [0]>} : vector<2x8x16xf32>, vector<2x16x8xf32>, vector<2x8x8xf32> -> vector<2x8x8xf32>
    "tpu.trace_stop"() : () -> ()
    %74 = vector.shape_cast %73 : vector<2x8x8xf32> to vector<16x8xf32>
    %75 = vector.extract_strided_slice %62 {offsets = [8, 0], sizes = [8, 32], strides = [1, 1]} : vector<32x32xf32> to vector<8x32xf32>
    %cst_39 = arith.constant dense<0.000000e+00> : vector<16x32xf32>
    %76 = tpu.matmul %74, %75, %cst_39 {dimension_numbers = #tpu.dot_dimension_numbers<[1], [0], [0], [1], [0, 0, 1, 1], [], []>} : vector<16x8xf32>, vector<8x32xf32>, vector<16x32xf32> -> vector<16x32xf32>
    %77 = arith.addf %70, %76 : vector<16x32xf32>
    %78 = vector.extract_strided_slice %61 {offsets = [0, 16, 0], sizes = [2, 8, 16], strides = [1, 1, 1]} : vector<2x32x16xf32> to vector<2x8x16xf32>
    %79 = vector.extract_strided_slice %29 {offsets = [0, 0, 16], sizes = [2, 16, 8], strides = [1, 1, 1]} : vector<2x16x32xf32> to vector<2x16x8xf32>
    "tpu.trace_start"() <{level = 10 : i32, message = "bqk,bkd->bqd"}> : () -> ()
    %cst_40 = arith.constant dense<0.000000e+00> : vector<2x8x8xf32>
    %80 = tpu.matmul %78, %79, %cst_40 {dimension_numbers = #tpu.dot_dimension_numbers<[2], [1], [1], [2], [0, 0, 0, 1, 1, 2], [0], [0]>} : vector<2x8x16xf32>, vector<2x16x8xf32>, vector<2x8x8xf32> -> vector<2x8x8xf32>
    "tpu.trace_stop"() : () -> ()
    %81 = vector.shape_cast %80 : vector<2x8x8xf32> to vector<16x8xf32>
    %82 = vector.extract_strided_slice %62 {offsets = [16, 0], sizes = [8, 32], strides = [1, 1]} : vector<32x32xf32> to vector<8x32xf32>
    %cst_41 = arith.constant dense<0.000000e+00> : vector<16x32xf32>
    %83 = tpu.matmul %81, %82, %cst_41 {dimension_numbers = #tpu.dot_dimension_numbers<[1], [0], [0], [1], [0, 0, 1, 1], [], []>} : vector<16x8xf32>, vector<8x32xf32>, vector<16x32xf32> -> vector<16x32xf32>
    %84 = arith.addf %77, %83 : vector<16x32xf32>
    %85 = vector.extract_strided_slice %61 {offsets = [0, 24, 0], sizes = [2, 8, 16], strides = [1, 1, 1]} : vector<2x32x16xf32> to vector<2x8x16xf32>
    %86 = vector.extract_strided_slice %29 {offsets = [0, 0, 24], sizes = [2, 16, 8], strides = [1, 1, 1]} : vector<2x16x32xf32> to vector<2x16x8xf32>
    "tpu.trace_start"() <{level = 10 : i32, message = "bqk,bkd->bqd"}> : () -> ()
    %cst_42 = arith.constant dense<0.000000e+00> : vector<2x8x8xf32>
    %87 = tpu.matmul %85, %86, %cst_42 {dimension_numbers = #tpu.dot_dimension_numbers<[2], [1], [1], [2], [0, 0, 0, 1, 1, 2], [0], [0]>} : vector<2x8x16xf32>, vector<2x16x8xf32>, vector<2x8x8xf32> -> vector<2x8x8xf32>
    "tpu.trace_stop"() : () -> ()
    %88 = vector.shape_cast %87 : vector<2x8x8xf32> to vector<16x8xf32>
    %89 = vector.extract_strided_slice %62 {offsets = [24, 0], sizes = [8, 32], strides = [1, 1]} : vector<32x32xf32> to vector<8x32xf32>
    %cst_43 = arith.constant dense<0.000000e+00> : vector<16x32xf32>
    %90 = tpu.matmul %88, %89, %cst_43 {dimension_numbers = #tpu.dot_dimension_numbers<[1], [0], [0], [1], [0, 0, 1, 1], [], []>} : vector<16x8xf32>, vector<8x32xf32>, vector<16x32xf32> -> vector<16x32xf32>
    %91 = arith.addf %84, %90 : vector<16x32xf32>
    %c0_44 = arith.constant 0 : index
    %c0_45 = arith.constant 0 : index
    %92 = vector.load %arg12[%c0_44, %c0_45] : memref<1x32xf32, #tpu.memory_space<vmem>>, vector<1x32xf32>
    %93 = vector.shape_cast %92 : vector<1x32xf32> to vector<32xf32>
    %94 = vector.shape_cast %93 : vector<32xf32> to vector<1x32xf32>
    %95 = vector.broadcast %94 : vector<1x32xf32> to vector<16x32xf32>
    %96 = arith.addf %91, %95 : vector<16x32xf32>
    %97 = arith.addf %96, %1 : vector<16x32xf32>
    %cst_46 = arith.constant dense<0.000000e+00> : vector<16xf32>
    %98 = vector.multi_reduction <add>, %97, %cst_46 [1] : vector<16x32xf32> to vector<16xf32>
    %99 = vector.shape_cast %98 : vector<16xf32> to vector<16x1xf32>
    %cst_47 = arith.constant 3.200000e+01 : f32
    %100 = vector.broadcast %cst_47 : f32 to vector<16x1xf32>
    %101 = arith.divf %99, %100 : vector<16x1xf32>
    %102 = vector.broadcast %101 : vector<16x1xf32> to vector<16x32xf32>
    %103 = arith.subf %97, %102 : vector<16x32xf32>
    %104 = arith.mulf %103, %103 : vector<16x32xf32>
    %cst_48 = arith.constant dense<0.000000e+00> : vector<16xf32>
    %105 = vector.multi_reduction <add>, %104, %cst_48 [1] : vector<16x32xf32> to vector<16xf32>
    %106 = vector.shape_cast %105 : vector<16xf32> to vector<16x1xf32>
    %cst_49 = arith.constant 3.200000e+01 : f32
    %107 = vector.broadcast %cst_49 : f32 to vector<16x1xf32>
    %108 = arith.divf %106, %107 : vector<16x1xf32>
    %109 = vector.broadcast %101 : vector<16x1xf32> to vector<16x32xf32>
    %110 = arith.subf %97, %109 : vector<16x32xf32>
    %cst_50 = arith.constant 9.99999996E-13 : f32
    %111 = vector.broadcast %cst_50 : f32 to vector<16x1xf32>
    %112 = arith.addf %108, %111 : vector<16x1xf32>
    %113 = math.rsqrt %112 : vector<16x1xf32>
    %114 = vector.broadcast %113 : vector<16x1xf32> to vector<16x32xf32>
    %115 = arith.mulf %110, %114 : vector<16x32xf32>
    %c0_51 = arith.constant 0 : index
    %c0_52 = arith.constant 0 : index
    %116 = vector.load %arg13[%c0_51, %c0_52] : memref<1x32xf32, #tpu.memory_space<vmem>>, vector<1x32xf32>
    %117 = vector.shape_cast %116 : vector<1x32xf32> to vector<32xf32>
    %118 = vector.shape_cast %117 : vector<32xf32> to vector<1x32xf32>
    %119 = vector.broadcast %118 : vector<1x32xf32> to vector<16x32xf32>
    %120 = arith.mulf %115, %119 : vector<16x32xf32>
    %c0_53 = arith.constant 0 : index
    %c0_54 = arith.constant 0 : index
    %121 = vector.load %arg14[%c0_53, %c0_54] : memref<1x32xf32, #tpu.memory_space<vmem>>, vector<1x32xf32>
    %122 = vector.shape_cast %121 : vector<1x32xf32> to vector<32xf32>
    %123 = vector.shape_cast %122 : vector<32xf32> to vector<1x32xf32>
    %124 = vector.broadcast %123 : vector<1x32xf32> to vector<16x32xf32>
    %125 = arith.addf %120, %124 : vector<16x32xf32>
    %c0_55 = arith.constant 0 : index
    %c0_56 = arith.constant 0 : index
    %126 = vector.load %arg15[%c0_55, %c0_56] : memref<16x32xf32, #tpu.memory_space<vmem>>, vector<16x32xf32>
    tpu.vector_store %arg15[%c0_55, %c0_56], %125 {strides = array<i32>} : memref<16x32xf32, #tpu.memory_space<vmem>>, vector<16x32xf32>,
    return
  }
  func.func @transform_0(%arg0: i32) -> (i32, i32, i32) {
    %c0_i32 = arith.constant 0 : i32
    %c0_i32_0 = arith.constant 0 : i32
    %c0_i32_1 = arith.constant 0 : i32
    return %arg0, %c0_i32, %c0_i32_0 : i32, i32, i32
  }
  func.func @transform_1(%arg0: i32) -> (i32, i32, i32) {
    %c0_i32 = arith.constant 0 : i32
    %c0_i32_0 = arith.constant 0 : i32
    %c0_i32_1 = arith.constant 0 : i32
    return %arg0, %c0_i32, %c0_i32_0 : i32, i32, i32
  }
  func.func @transform_2(%arg0: i32) -> (i32, i32, i32) {
    %c0_i32 = arith.constant 0 : i32
    %c0_i32_0 = arith.constant 0 : i32
    %c0_i32_1 = arith.constant 0 : i32
    return %arg0, %c0_i32, %c0_i32_0 : i32, i32, i32
  }
  func.func @transform_3(%arg0: i32) -> (i32, i32, i32) {
    %c0_i32 = arith.constant 0 : i32
    %c0_i32_0 = arith.constant 0 : i32
    %c0_i32_1 = arith.constant 0 : i32
    return %arg0, %c0_i32, %c0_i32_0 : i32, i32, i32
  }
  func.func @transform_4(%arg0: i32) -> (i32, i32) {
    %c0_i32 = arith.constant 0 : i32
    %c0_i32_0 = arith.constant 0 : i32
    %c0_i32_1 = arith.constant 0 : i32
    return %c0_i32, %c0_i32_0 : i32, i32
  }
  func.func @transform_5(%arg0: i32) -> (i32, i32) {
    %c0_i32 = arith.constant 0 : i32
    %c0_i32_0 = arith.constant 0 : i32
    %c0_i32_1 = arith.constant 0 : i32
    return %c0_i32, %c0_i32_0 : i32, i32
  }
  func.func @transform_6(%arg0: i32) -> (i32, i32) {
    %c0_i32 = arith.constant 0 : i32
    %c0_i32_0 = arith.constant 0 : i32
    %c0_i32_1 = arith.constant 0 : i32
    return %c0_i32, %c0_i32_0 : i32, i32
  }
  func.func @transform_7(%arg0: i32) -> (i32, i32) {
    %c0_i32 = arith.constant 0 : i32
    %c0_i32_0 = arith.constant 0 : i32
    %c0_i32_1 = arith.constant 0 : i32
    return %c0_i32, %c0_i32_0 : i32, i32
  }
  func.func @transform_8(%arg0: i32) -> (i32, i32) {
    %c0_i32 = arith.constant 0 : i32
    %c0_i32_0 = arith.constant 0 : i32
    %c0_i32_1 = arith.constant 0 : i32
    return %c0_i32, %c0_i32_0 : i32, i32
  }
  func.func @transform_9(%arg0: i32) -> (i32, i32) {
    %c0_i32 = arith.constant 0 : i32
    %c0_i32_0 = arith.constant 0 : i32
    %c0_i32_1 = arith.constant 0 : i32
    return %c0_i32, %c0_i32_0 : i32, i32
  }
  func.func @transform_10(%arg0: i32) -> (i32, i32) {
    %c0_i32 = arith.constant 0 : i32
    %c0_i32_0 = arith.constant 0 : i32
    %c0_i32_1 = arith.constant 0 : i32
    return %c0_i32, %c0_i32_0 : i32, i32
  }
  func.func @transform_11(%arg0: i32) -> (i32, i32) {
    %c0_i32 = arith.constant 0 : i32
    %c0_i32_0 = arith.constant 0 : i32
    %c0_i32_1 = arith.constant 0 : i32
    return %c0_i32, %c0_i32_0 : i32, i32
  }
  func.func @transform_12(%arg0: i32) -> (i32, i32) {
    %c0_i32 = arith.constant 0 : i32
    %c0_i32_0 = arith.constant 0 : i32
    %c0_i32_1 = arith.constant 0 : i32
    return %c0_i32, %c0_i32_0 : i32, i32
  }
  func.func @transform_13(%arg0: i32) -> (i32, i32) {
    %c0_i32 = arith.constant 0 : i32
    %c0_i32_0 = arith.constant 0 : i32
    %c0_i32_1 = arith.constant 0 : i32
    return %c0_i32, %c0_i32_0 : i32, i32
  }
  func.func @transform_14(%arg0: i32) -> (i32, i32) {
    %c0_i32 = arith.constant 0 : i32
    %c0_i32_0 = arith.constant 0 : i32
    return %arg0, %c0_i32 : i32, i32
  }
}

</mosaic_0001>

<bundles_post_ra>
// kernel: tpu_custom_call.1
= control target key start
LH: loop header
LB: loop body
LE: loop exit
PB: predicated region body
PF: predicated region fallthrough
CT: control target
= control target key end

     0   :  { %19 = vsyncpa [#allocation3], 0  ;;  %s1753_s0 = inlined_call_operand.hbm [shape: f32[2,8,32], index: 0, kind: input, shape index: {}]   ;;  %s1754_s1 = inlined_call_operand.hbm [shape: f32[2,16,16], index: 1, kind: input, shape index: {}]   ;;  %s1755_s2 = inlined_call_operand.hbm [shape: f32[2,16,16], index: 2, kind: input, shape index: {}]   ;;  %s1756_s3 = inlined_call_operand.hbm [shape: f32[2,8,16], index: 3, kind: input, shape index: {}]   ;;  %s1757_s4 = inlined_call_operand.hbm [shape: f32[32,32], index: 4, kind: input, shape index: {}]   ;;  %s1758_s5 = inlined_call_operand.vmem [shape: f32[1,32], index: 5, kind: input, shape index: {}]   ;;  %s1759_s6 = inlined_call_operand.hbm [shape: f32[16,32], index: 6, kind: input, shape index: {}]   ;;  %s1760_s7 = inlined_call_operand.vmem [shape: f32[1,32], index: 7, kind: input, shape index: {}]   ;;  %s1761_s8 = inlined_call_operand.hbm [shape: f32[16,32], index: 8, kind: input, shape index: {}]   ;;  %s1762_s9 = inlined_call_operand.vmem [shape: f32[1,32], index: 9, kind: input, shape index: {}]   ;;  %s1763_s10 = inlined_call_operand.hbm [shape: f32[32,32], index: 10, kind: input, shape index: {}]   ;;  %s1764_s11 = inlined_call_operand.vmem [shape: f32[1,32], index: 11, kind: input, shape index: {}]   ;;  %s1765_s12 = inlined_call_operand.vmem [shape: f32[1,32], index: 12, kind: input, shape index: {}]   ;;  %s1766_s13 = inlined_call_operand.vmem [shape: f32[1,32], index: 13, kind: input, shape index: {}]   ;;  %s1767_s14 = inlined_call_operand.hbm [shape: f32[16,32], index: 14, kind: output, shape index: {}]  }
   0x1   :  { %20 = vsyncpa [#allocation6], 0 }
   0x2   :  { %21 = vsyncpa [#allocation9], 0 }
   0x3   :  { %22 = vsyncpa [#allocation12], 0 }
   0x4   :  { %23 = vsyncpa [#allocation15], 0 }
   0x5   :  { %24 = vsyncpa [#allocation4], 0  ;;  %s42_s15 = sshll.u32 %s1754_s1, 4  ;;  %s1474_s16 = smov [#allocation5]   ;;  %s43_s15 = int_to_ptr.hbm [resolvable:$true] %s42_s15 }
   0x6   :  { %s44_s17 = sshll.u32 %s1474_s16, 4  ;;  %s68_s20 = sshll.u32 %s1756_s3, 4  ;;  %s45_s17 = int_to_ptr.vmem [resolvable:$true] %s44_s17  ;;  %s69_s20 = int_to_ptr.hbm [resolvable:$true] %s68_s20 }
   0x7   :  { %s1475_s21 = smov 128   ;;  %s1476_s22 = smov 8  }
   0x8   :  { %50 = dma.hbm_to_vmem [thread:$0]  %s43_s15, 512, %s45_s17, [#allocation6], %s1475_s21, %s1475_s21, %s1476_s22  }
   0x9   :  { %s1477_s23 = smov [#allocation8]   ;;  %s96_s1 = sshll.u32 %s1759_s6, 4  ;;  %s97_s1 = int_to_ptr.hbm [resolvable:$true] %s96_s1 }
   0xa   :  { %s70_s24 = sshll.u32 %s1477_s23, 4  ;;  %s29_s28 = sshll.u32 %s1753_s0, 4  ;;  %s71_s24 = int_to_ptr.vmem [resolvable:$true] %s70_s24  ;;  %s30_s28 = int_to_ptr.hbm [resolvable:$true] %s29_s28 }
   0xb   :  { %76 = dma.hbm_to_vmem [thread:$0]  %s69_s20, 256, %s71_s24, [#allocation9], %s1475_s21, %s1475_s21, %s1476_s22  }
   0xc   :  { %s1478_s29 = smov [#allocation11]   ;;  %s1479_s15 = smov [#allocation2]  }
   0xd   :  { %s98_s30 = sshll.u32 %s1478_s29, 4  ;;  %s31_s6 = sshll.u32 %s1479_s15, 4  ;;  %s99_s30 = int_to_ptr.vmem [resolvable:$true] %s98_s30  ;;  %s32_s6 = int_to_ptr.vmem [resolvable:$true] %s31_s6 }
   0xe   :  { %104 = dma.hbm_to_vmem [thread:$0]  %s97_s1, 256, %s99_s30, [#allocation12], %s1475_s21, %s1475_s21, %s1476_s22  }
   0xf   :  { %s55_s18 = sshll.u32 %s1755_s2, 4  ;;  %s81_s20 = sshll.u32 %s1757_s4, 4  ;;  %s56_s18 = int_to_ptr.hbm [resolvable:$true] %s55_s18  ;;  %s82_s20 = int_to_ptr.hbm [resolvable:$true] %s81_s20 }
  0x10   :  { %37 = dma.hbm_to_vmem [thread:$0]  %s30_s28, 256, %s32_s6, [#allocation3], %s1475_s21, %s1475_s21, %s1476_s22  }
  0x11   :  { %s1480_s23 = smov [#allocation7]   ;;  %s1481_s25 = smov [#allocation10]  }
  0x12   :  { %s57_s24 = sshll.u32 %s1480_s23, 4  ;;  %s83_s2 = sshll.u32 %s1481_s25, 4  ;;  %s58_s24 = int_to_ptr.vmem [resolvable:$true] %s57_s24  ;;  %s84_s2 = int_to_ptr.vmem [resolvable:$true] %s83_s2 }
  0x13   :  { %63 = dma.hbm_to_vmem [thread:$0]  %s56_s18, 512, %s58_s24, [#allocation6], %s1475_s21, %s1475_s21, %s1476_s22  }
  0x14   :  { %s111_s3 = sshll.u32 %s1761_s8, 4  ;;  %s126_s28 = sshll.u32 %s1763_s10, 4  ;;  %s112_s3 = int_to_ptr.hbm [resolvable:$true] %s111_s3  ;;  %s127_s28 = int_to_ptr.hbm [resolvable:$true] %s126_s28 }
  0x15   :  { %89 = dma.hbm_to_vmem [thread:$0]  %s82_s20, 512, %s84_s2, [#allocation9], %s1475_s21, %s1475_s21, %s1476_s22  }
  0x16   :  { %s1482_s29 = smov [#allocation13]   ;;  %s1483_s15 = smov [#allocation14]  }
  0x17   :  { %s113_s30 = sshll.u32 %s1482_s29, 4  ;;  %s128_s8 = sshll.u32 %s1483_s15, 4  ;;  %s114_s30 = int_to_ptr.vmem [resolvable:$true] %s113_s30  ;;  %s129_s8 = int_to_ptr.vmem [resolvable:$true] %s128_s8 }
  0x18   :  { %119 = dma.hbm_to_vmem [thread:$0]  %s112_s3, 256, %s114_s30, [#allocation12], %s1475_s21, %s1475_s21, %s1476_s22  }
  0x19   :  { %134 = dma.hbm_to_vmem [thread:$0]  %s127_s28, 512, %s129_s8, [#allocation15], %s1475_s21, %s1475_s21, %s1476_s22  }
  0x1a   :  { %1462 = dma.done.wait [#allocation3], 256  }
  0x1b   :  { %1463 = vsyncadd [#allocation3], 4294967040 }
  0x1c   :  { %1464 = dma.done.wait [#allocation6], 1024  }
  0x1d   :  { %1465 = vsyncadd [#allocation6], 4294966272 }
  0x1e   :  { %1466 = dma.done.wait [#allocation9], 768  }
  0x1f   :  { %1467 = vsyncadd [#allocation9], 4294966528 }
  0x20   :  { %1468 = dma.done.wait [#allocation12], 512  }
  0x21   :  { %1469 = vsyncadd [#allocation12], 4294966784 }
  0x22   :  { %1470 = dma.done.wait [#allocation15], 512  }
  0x23   :  { %1471 = vsyncadd [#allocation15], 4294966784  ;;  %v222_v0 = vld [vmem:[#allocation11 + $0x8] sm:$0xff]  ;;  %v221_v1 = vld [vmem:[#allocation11] sm:$0xff]  ;;  %vm227_vm0 = vcmask 130048   ;;  %vm191_vm1 = vcmask 261120  }
  0x24   :  { %254 = vmatpush.msra.mxu1 %v222_v0  ;;  %v175_v2 = vld [vmem:[#allocation5] sm:$0xff]  ;;  %v186_v3 = vld [vmem:[#allocation10 + $0x18] sm:$0xff]  ;;  %v184_v5 = vld [vmem:[#allocation10 + $0x8] sm:$0xff]  ;;  %s1484_s16 = smov 120   ;;  %vm322_vm2 = vcmask 64512   ;;  %s1088_s3 = sshll.u32 %s1767_s14, 4  ;;  %s1089_s3 = int_to_ptr.hbm [resolvable:$true] %s1088_s3 }
  0x25   :  { %v185_v4 = vld [vmem:[#allocation10 + $0x10] sm:$0xff]  ;;  %210 = vmatpush.msra.mxu0 %v186_v3  ;;  %v183_v6 = vld [vmem:[#allocation10] sm:$0xff]  ;;  %v176_v8 = vld [vmem:[#allocation5 + $0x8] sm:$0xff] }
  0x26   :  { %255 = vmatpush.msra.mxu1 %v221_v1  ;;  %v1613_v7 = vld [vmem:[#allocation2] sm:$0xff]  ;;  %v1618_v9 = vld [vmem:[#allocation2 + $0x8] sm:$0xff]  ;;  %v270_v12 = vld [vmem:[#allocation13 + $0x8] sm:$0xff] }
  0x27   :  { %1107 = vmatmul.msk.f32.vlgmr.msra.gmra.mxu1 %vm227_vm0, %v175_v2  ;;  %211 = vmatpush.msra.mxu0 %v185_v4  ;;  %v177_v10 = vld [vmem:[#allocation5 + $0x10] sm:$0xff]  ;;  %v178_v11 = vld [vmem:[#allocation5 + $0x18] sm:$0xff]  ;;  %v269_v13 = vld [vmem:[#allocation13] sm:$0xff] }
  0x28   :  { %301 = vmatpush.msra.mxu2 %v270_v12  ;;  %v179_v14 = vld [vmem:[#allocation7] sm:$0xff]  ;;  %v180_v15 = vld [vmem:[#allocation7 + $0x8] sm:$0xff]  ;;  %v181_v16 = vld [vmem:[#allocation7 + $0x10] sm:$0xff] }
  0x29   :  { %212 = vmatpush.msra.mxu0 %v184_v5  ;;  %v182_v17 = vld [vmem:[#allocation7 + $0x18] sm:$0xff]  ;;  %v1202_v18 = vld [vmem:[%s1760_s7] ss:$0 sm:$0xff]  ;;  %s1486_s7 = smov 104   ;;  %v317_v59 = vld [vmem:[#allocation8 + $0x8] sm:$0xff] }
  0x2a   :  { %302 = vmatpush.msra.mxu2 %v269_v13  ;;  %v1203_v21 = vld [vmem:[%s1758_s5] ss:$0 sm:$0xff]  ;;  %s1485_s5 = smov 112   ;;  %v316_v61 = vld [vmem:[#allocation8] sm:$0xff]  ;;  %v1116_v62 = vadd.f32 -1.0, %v317_v59 }
  0x2b   :  { %213 = vmatpush.msra.mxu0 %v183_v6  ;;  %1111 = vmatmul.msk.f32.vlgmr.msra.gmra.mxu2 %vm227_vm0, %v179_v14  ;;  %v1204_v45 = vld [vmem:[%s1762_s9] ss:$0 sm:$0xff]  ;;  %v1115_v63 = vadd.f32 -1.0, %v316_v61 }
  0x2c   :  { %1105 = vmatmul.msk.f32.vlgmr.msra.gmra.mxu0 %vm191_vm1, %v1613_v7  ;;  %v321_v0 = vmul.f32 10000.0, %v1116_v62 }
  0x2d   :  { %v320_v2 = vmul.f32 10000.0, %v1115_v63 }
  0x2f   :  { %1108 = vmatmul.msk.f32.gmra.mxu1 %vm227_vm0, %v176_v8 }
  0x33   :  { %1112 = vmatmul.msk.f32.gmra.mxu2 %vm227_vm0, %v180_v15 }
  0x34   :  { %1106 = vmatmul.msk.f32.gmra.mxu0 %vm191_vm1, %v1618_v9 }
  0x37   :  { %1109 = vmatmul.msk.f32.gmra.mxu1 %vm227_vm0, %v177_v10 }
  0x3b   :  { %1113 = vmatmul.msk.f32.gmra.mxu2 %vm227_vm0, %v181_v16 }
  0x3f   :  { %1110 = vmatmul.msk.f32.gmra.mxu1 %vm227_vm0, %v178_v11 }
  0x43   :  { %1114 = vmatmul.msk.f32.gmra.mxu2 %vm227_vm0, %v182_v17 }
  0xa4   :  { %v257_v19 = vpop.f32.mrf.mxu1 }
  0xa5   :  { %v258_v20 = vadd.f32 %v1202_v18, %v257_v19 }
  0xa7   :  { %383 = vrot.lane.b32.xlu2 %v258_v20, %s1484_s16 }
  0xa9   :  { %v215_v22 = vpop.f32.mrf.mxu0 }
  0xaa   :  { %v216_v23 = vadd.f32 %v1203_v21, %v215_v22 }
  0xac   :  { %v260_v24 = vpop.f32.mrf.mxu1 }
  0xad   :  { %v261_v25 = vadd.f32 %v1202_v18, %v260_v24 }
  0xae   :  { %v304_v32 = vpop.f32.mrf.mxu2 }
  0xaf   :  { %1117 = vmatpush.xpose.msk.msrb.mxu2 %vm322_vm2, %v261_v25  ;;  %381 = vrot.lane.b32.xlu2 %v216_v23, %s1484_s16  ;;  %v305_v58 = vadd.f32 %v1204_v45, %v304_v32 }
  0xb1   :  { %v218_v26 = vpop.f32.mrf.mxu0 }
  0xb2   :  { %v219_v27 = vadd.f32 %v1203_v21, %v218_v26 }
  0xb3   :  { %1118 = vmatpush.xpose.msk.msrb.mxu2 %vm322_vm2, %v258_v20 }
  0xb4   :  { %v263_v28 = vpop.f32.mrf.mxu1 }
  0xb5   :  { %v264_v29 = vadd.f32 %v1202_v18, %v263_v28 }
  0xb6   :  { %1119 = vmatmul.msk.f32.vlgmr.msrb.gmra.mxu2 %vm322_vm2, %v216_v23  ;;  %v307_v35 = vpop.f32.mrf.mxu2 }
  0xb7   :  { %415 = vrot.lane.b32.xlu1 %v264_v29, %s1484_s16  ;;  %477 = vrot.lane.b32.xlu2 %v219_v27, %s1485_s5  ;;  %v308_v55 = vadd.f32 %v1204_v45, %v307_v35 }
  0xb9   :  { %v1172_v10 = vpack.i.bf16 %v305_v58, %v308_v55 }
  0xbc   :  { %v266_v30 = vpop.f32.mrf.mxu1 }
  0xbd   :  { %v267_v31 = vadd.f32 %v1202_v18, %v266_v30 }
  0xbe   :  { %v310_v41 = vpop.f32.mrf.mxu2 }
  0xbf   :  { %417 = vrot.lane.b32.xlu0 %v267_v31, %s1484_s16  ;;  %1120 = vmatpush.xpose.msk.msra.mxu3 %vm322_vm2, %v267_v31  ;;  %v311_v49 = vadd.f32 %v1204_v45, %v310_v41 }
  0xc0   :  { %413 = vrot.lane.b32.xlu1 %v219_v27, %s1484_s16  ;;  %509 = vrot.lane.b32.xlu2 %v216_v23, %s1486_s7 }
  0xc3   :  { %1121 = vmatpush.xpose.msk.msra.mxu3 %vm322_vm2, %v264_v29 }
  0xc6   :  { %1122 = vmatmul.msk.f32.vlgmr.msra.gmra.mxu3 %vm322_vm2, %v219_v27  ;;  %v313_v46 = vpop.f32.mrf.mxu2 }
  0xc7   :  { %385 = vrot.lane.b32.xlu0 %v261_v25, %s1484_s16  ;;  %v314_v47 = vadd.f32 %v1204_v45, %v313_v46 }
  0xc8   :  { %479 = vrot.lane.b32.xlu1 %v264_v29, %s1485_s5  ;;  %543 = vrot.lane.b32.xlu2 %v264_v29, %s1486_s7 }
  0xc9   :  { %v1681_v11 = vpack.i.bf16 %v311_v49, %v314_v47 }
  0xcf   :  { %481 = vrot.lane.b32.xlu0 %v267_v31, %s1485_s5 }
  0xd0   :  { %511 = vrot.lane.b32.xlu1 %v258_v20, %s1486_s7  ;;  %445 = vrot.lane.b32.xlu2 %v216_v23, %s1485_s5 }
  0xd7   :  { %513 = vrot.lane.b32.xlu0 %v261_v25, %s1486_s7 }
  0xd8   :  { %449 = vrot.lane.b32.xlu1 %v261_v25, %s1485_s5 }
  0xdf   :  { %545 = vrot.lane.b32.xlu0 %v267_v31, %s1486_s7 }
  0xe0   :  { %541 = vrot.lane.b32.xlu1 %v219_v27, %s1486_s7 }
  0xe7   :  { %447 = vrot.lane.b32.xlu0 %v258_v20, %s1485_s5 }
 0x101   :  { %v384_v34 = vpop.permute.xlu2 %383 }
 0x109   :  { %v382_v38 = vpop.permute.xlu2 %381 }
 0x111   :  { %v478_v42 = vpop.permute.xlu2 %477 }
 0x11a   :  { %v510_v48 = vpop.permute.xlu2 %509 }
 0x122   :  { %v544_v53 = vpop.permute.xlu2 %543 }
 0x129   :  { %v416_v33 = vpop.permute.xlu1 %415 }
 0x12a   :  { %v446_v57 = vpop.permute.xlu2 %445 }
 0x131   :  { %v418_v36 = vpop.permute.xlu0 %417 }
 0x132   :  { %v414_v37 = vpop.permute.xlu1 %413  ;;  %1126 = vmatpush.xpose.msk.msrb.mxu3 %vm322_vm2, %v418_v36 }
 0x136   :  { %1127 = vmatpush.xpose.msk.msrb.mxu3 %vm322_vm2, %v416_v33 }
 0x139   :  { %v386_v39 = vpop.permute.xlu0 %385  ;;  %1128 = vmatmul.msk.f32.vlgmr.msrb.gmra.mxu3 %vm322_vm2, %v414_v37  ;;  %v349_v28 = vpop.f32.mrf.mxu2 }
 0x13a   :  { %v480_v40 = vpop.permute.xlu1 %479  ;;  %1123 = vmatpush.xpose.msk.msrb.mxu0 %vm322_vm2, %v386_v39  ;;  %v350_v35 = vadd.f32 %v349_v28, %v320_v2 }
 0x13c   :  { %v573_v36 = vsel %vm227_vm0, %v350_v35, -inf }
 0x13e   :  { %1124 = vmatpush.xpose.msk.msrb.mxu0 %vm322_vm2, %v384_v34 }
 0x141   :  { %v482_v43 = vpop.permute.xlu0 %481  ;;  %1125 = vmatmul.msk.f32.vlgmr.msrb.gmra.mxu0 %vm322_vm2, %v382_v38 }
 0x142   :  { %v512_v44 = vpop.permute.xlu1 %511  ;;  %1132 = vmatpush.xpose.msk.msra.mxu3 %vm322_vm2, %v482_v43 }
 0x146   :  { %1133 = vmatpush.xpose.msk.msra.mxu3 %vm322_vm2, %v480_v40 }
 0x149   :  { %v514_v50 = vpop.permute.xlu0 %513  ;;  %1134 = vmatmul.msk.f32.vlgmr.msra.gmra.mxu3 %vm322_vm2, %v478_v42  ;;  %v378_v60 = vpop.f32.mrf.mxu3 }
 0x14a   :  { %705 = vmatpush.msrb.mxu3 %v314_v47  ;;  %v450_v51 = vpop.permute.xlu1 %449  ;;  %1135 = vmatpush.xpose.msk.msrb.mxu1 %vm322_vm2, %v514_v50  ;;  %v379_v37 = vadd.f32 %v378_v60, %v321_v0 }
 0x14b   :  { %1129 = vmatpush.xpose.msk.msra.mxu0 %vm322_vm2, %v450_v51 }
 0x14c   :  { %706 = vmatpush.msrb.mxu3 %v311_v49  ;;  %v585_v38 = vsel %vm227_vm0, %v379_v37, -inf }
 0x14e   :  { %1136 = vmatpush.xpose.msk.msrb.mxu1 %vm322_vm2, %v512_v44 }
 0x151   :  { %v546_v52 = vpop.permute.xlu0 %545  ;;  %1137 = vmatmul.msk.f32.vlgmr.msrb.gmra.mxu1 %vm322_vm2, %v510_v48 }
 0x152   :  { %1138 = vmatpush.xpose.msk.msra.mxu2 %vm322_vm2, %v546_v52  ;;  %v542_v54 = vpop.permute.xlu1 %541 }
 0x156   :  { %1139 = vmatpush.xpose.msk.msra.mxu2 %vm322_vm2, %v544_v53 }
 0x159   :  { %v448_v56 = vpop.permute.xlu0 %447  ;;  %1140 = vmatmul.msk.f32.vlgmr.msra.gmra.mxu2 %vm322_vm2, %v542_v54 }
 0x15a   :  { %1130 = vmatpush.xpose.msk.msra.mxu0 %vm322_vm2, %v448_v56 }
 0x15d   :  { %1131 = vmatmul.msk.f32.vlgmr.msra.gmra.mxu0 %vm322_vm2, %v446_v57 }
 0x15e   :  { %682 = vmatpush.msrb.mxu0 %v308_v55 }
 0x160   :  { %683 = vmatpush.msrb.mxu0 %v305_v58 }
 0x1bc   :  { %v442_v1 = vpop.f32.mrf.mxu3 }
 0x1bd   :  { %v443_v3 = vadd.f32 %v442_v1, %v321_v0 }
 0x1be   :  { %v410_v4 = vpop.f32.mrf.mxu0 }
 0x1bf   :  { %v411_v5 = vadd.f32 %v410_v4, %v320_v2  ;;  %v588_v6 = vsel %vm227_vm0, %v443_v3, -inf }
 0x1c0   :  { %589 = vmax.xlane.f32.xlu1 %v588_v6 }
 0x1c1   :  { %v576_v8 = vsel %vm227_vm0, %v411_v5, -inf }
 0x1c2   :  { %577 = vmax.xlane.f32.xlu0 %v576_v8 }
 0x1cc   :  { %v506_v12 = vpop.f32.mrf.mxu3 }
 0x1cd   :  { %v1686_v13 = vadd.f32 %v506_v12, %v321_v0 }
 0x1ce   :  { %v538_v39 = vpop.f32.mrf.mxu1 }
 0x1cf   :  { %v591_v16 = vsel %vm227_vm0, %v1686_v13, -inf  ;;  %v539_v40 = vadd.f32 %v538_v39, %v320_v2 }
 0x1d1   :  { %v582_v41 = vsel %vm227_vm0, %v539_v40, -inf }
 0x1d6   :  { %1173 = vrot.lane.b32.xlu0 %v1172_v10, %s1484_s16 }
 0x1d9   :  { %1178 = vrot.lane.b32.xlu1 %v1681_v11, %s1484_s16 }
 0x1da   :  { %v474_v14 = vpop.f32.mrf.mxu0 }
 0x1db   :  { %v1688_v15 = vadd.f32 %v474_v14, %v320_v2 }
 0x1dc   :  { %v570_v42 = vpop.f32.mrf.mxu2 }
 0x1dd   :  { %v579_v17 = vsel %vm227_vm0, %v1688_v15, -inf  ;;  %v571_v43 = vadd.f32 %v570_v42, %v321_v0 }
 0x1df   :  { %v594_v44 = vsel %vm227_vm0, %v571_v43, -inf }
 0x200   :  { %592 = vmax.xlane.f32.xlu0 %v591_v16 }
 0x203   :  { %580 = vmax.xlane.f32.xlu1 %v579_v17 }
 0x214   :  { %1183 = vrot.lane.b32.xlu0 %v1681_v11, %s1485_s5 }
 0x21c   :  { %1193 = vrot.lane.b32.xlu0 %v1172_v10, %s1485_s5  ;;  %1188 = vrot.lane.b32.xlu1 %v1172_v10, %s1486_s7 }
 0x233   :  { %v590_v18 = vpop.xlane.xlu1 %589 }
 0x234   :  { %v602_v21 = vsub.f32 %v443_v3, %v590_v18 }
 0x235   :  { %v578_v19 = vpop.xlane.xlu0 %577 }
 0x236   :  { %v598_v20 = vsub.f32 %v411_v5, %v578_v19  ;;  %v615_v23 = vmul.f32 1.442695, %v602_v21 }
 0x238   :  { %v607_v22 = vmul.f32 1.442695, %v598_v20 }
 0x23a   :  { %1208 = vpow2.f32 %v607_v22 }
 0x23b   :  { %1210 = vpow2.f32 %v615_v23 }
 0x240   :  { %v1209_v24 = vpop.eup %1208 }
 0x241   :  { %v624_v25 = vsel %vm227_vm0, %v1209_v24, 0.0  ;;  %v1211_v26 = vpop.eup %1210 }
 0x242   :  { %625 = vadd.xlane.f32.xlu2 %v624_v25  ;;  %v636_v27 = vsel %vm227_vm0, %v1211_v26, 0.0 }
 0x248   :  { %v1174_v29 = vpop.permute.xlu0 %1173 }
 0x249   :  { %v1176_v30 = vunpack.i.h.bf16 %v1174_v29  ;;  %v1175_v31 = vunpack.i.l.bf16 %v1174_v29 }
 0x24a   :  { %637 = vadd.xlane.f32.xlu2 %v636_v27 }
 0x24b   :  { %v1179_v32 = vpop.permute.xlu1 %1178  ;;  %736 = vmatpush.msra.mxu1 %v1175_v31 }
 0x24c   :  { %v1181_v33 = vunpack.i.h.bf16 %v1179_v32  ;;  %v1180_v34 = vunpack.i.l.bf16 %v1179_v32 }
 0x24d   :  { %737 = vmatpush.msra.mxu1 %v1176_v30  ;;  %v662_v30 = vld [vmem:[#allocation14 + $0x8] sm:$0xff] }
 0x24e   :  { %767 = vmatpush.msrb.mxu2 %v1180_v34  ;;  %794 = vmatpush.msra.mxu0 %v662_v30 }
 0x250   :  { %768 = vmatpush.msrb.mxu2 %v1181_v33 }
 0x252   :  { %574 = vmax.xlane.f32.xlu2 %v573_v36 }
 0x25a   :  { %586 = vmax.xlane.f32.xlu2 %v585_v38 }
 0x262   :  { %583 = vmax.xlane.f32.xlu2 %v582_v41 }
 0x26a   :  { %595 = vmax.xlane.f32.xlu2 %v594_v44 }
 0x273   :  { %v593_v45 = vpop.xlane.xlu0 %592 }
 0x276   :  { %v581_v53 = vpop.xlane.xlu1 %580 }
 0x277   :  { %v599_v12 = vsub.f32 %v1688_v15, %v581_v53  ;;  %v663_v53 = vld [vmem:[#allocation14 + $0x10] sm:$0xff] }
 0x279   :  { %v609_v17 = vmul.f32 1.442695, %v599_v12 }
 0x286   :  { %v1184_v46 = vpop.permute.xlu0 %1183 }
 0x287   :  { %v1186_v47 = vunpack.i.h.bf16 %v1184_v46  ;;  %v1185_v48 = vunpack.i.l.bf16 %v1184_v46 }
 0x289   :  { %883 = vmatpush.msra.mxu2 %v1185_v48 }
 0x28b   :  { %884 = vmatpush.msra.mxu2 %v1186_v47 }
 0x28e   :  { %v1194_v49 = vpop.permute.xlu0 %1193  ;;  %v1189_v57 = vpop.permute.xlu1 %1188 }
 0x28f   :  { %v1196_v50 = vunpack.i.h.bf16 %v1194_v49  ;;  %v1195_v51 = vunpack.i.l.bf16 %v1194_v49  ;;  %v1190_v61 = vunpack.i.l.bf16 %v1189_v57  ;;  %v1191_v63 = vunpack.i.h.bf16 %v1189_v57 }
 0x291   :  { %854 = vmatpush.msrb.mxu1 %v1195_v51 }
 0x293   :  { %855 = vmatpush.msrb.mxu1 %v1196_v50 }
 0x2b5   :  { %v626_v52 = vpop.xlane.xlu2 %625 }
 0x2b6   :  { %1212 = vrcp.f32 %v626_v52  ;;  %v661_v52 = vld [vmem:[#allocation14] sm:$0xff] }
 0x2b7   :  { %823 = vmatpush.msra.mxu3 %v661_v52 }
 0x2bc   :  { %v1213_v54 = vpop.eup %1212 }
 0x2bd   :  { %v654_v55 = vmul.f32 %v1213_v54, %v1209_v24  ;;  %v638_v56 = vpop.xlane.xlu2 %637  ;;  %v603_v24 = vsub.f32 %v1686_v13, %v593_v45 }
 0x2be   :  { %1214 = vrcp.f32 %v638_v56  ;;  %v664_v56 = vld [vmem:[#allocation14 + $0x18] sm:$0xff] }
 0x2bf   :  { %1143 = vmatmul.msk.f32.vlgmr.msra.gmra.mxu1 %vm227_vm0, %v654_v55  ;;  %v617_v25 = vmul.f32 1.442695, %v603_v24 }
 0x2c0   :  { %910 = vmatpush.msra.mxu1 %v663_v53  ;;  %v1207_v53 = vld [vmem:[%s1766_s13] ss:$0 sm:$0xff] }
 0x2c4   :  { %v1215_v58 = vpop.eup %1214 }
 0x2c5   :  { %v658_v59 = vmul.f32 %v1215_v58, %v1211_v26  ;;  %v575_v60 = vpop.xlane.xlu2 %574 }
 0x2c6   :  { %v597_v62 = vsub.f32 %v350_v35, %v575_v60 }
 0x2c7   :  { %1144 = vmatmul.msk.f32.vlgmr.msrb.gmra.mxu2 %vm227_vm0, %v658_v59 }
 0x2c8   :  { %v605_v0 = vmul.f32 1.442695, %v597_v62  ;;  %943 = vmatpush.msrb.mxu2 %v1190_v61 }
 0x2ca   :  { %1216 = vpow2.f32 %v605_v0  ;;  %944 = vmatpush.msrb.mxu2 %v1191_v63 }
 0x2cd   :  { %v587_v1 = vpop.xlane.xlu2 %586 }
 0x2ce   :  { %v601_v2 = vsub.f32 %v379_v37, %v587_v1 }
 0x2d0   :  { %v1217_v3 = vpop.eup %1216  ;;  %v613_v4 = vmul.f32 1.442695, %v601_v2 }
 0x2d1   :  { %v621_v5 = vsel %vm227_vm0, %v1217_v3, 0.0 }
 0x2d2   :  { %1218 = vpow2.f32 %v613_v4  ;;  %622 = vadd.xlane.f32.xlu2 %v621_v5  ;;  %v1205_v4 = vld [vmem:[%s1764_s11] ss:$0 sm:$0xff] }
 0x2d5   :  { %v584_v6 = vpop.xlane.xlu2 %583 }
 0x2d6   :  { %v600_v8 = vsub.f32 %v539_v40, %v584_v6 }
 0x2d8   :  { %v1219_v10 = vpop.eup %1218  ;;  %v611_v14 = vmul.f32 1.442695, %v600_v8 }
 0x2d9   :  { %v633_v16 = vsel %vm227_vm0, %v1219_v10, 0.0 }
 0x2da   :  { %1220 = vpow2.f32 %v611_v14  ;;  %634 = vadd.xlane.f32.xlu2 %v633_v16 }
 0x2db   :  { %1222 = vpow2.f32 %v609_v17 }
 0x2dd   :  { %v596_v18 = vpop.xlane.xlu2 %595 }
 0x2de   :  { %v604_v20 = vsub.f32 %v571_v43, %v596_v18 }
 0x2e0   :  { %v1221_v19 = vpop.eup %1220  ;;  %v619_v22 = vmul.f32 1.442695, %v604_v20 }
 0x2e1   :  { %v630_v21 = vsel %vm227_vm0, %v1221_v19, 0.0  ;;  %v1223_v23 = vpop.eup %1222 }
 0x2e2   :  { %631 = vadd.xlane.f32.xlu2 %v630_v21  ;;  %1224 = vpow2.f32 %v619_v22  ;;  %v627_v15 = vsel %vm227_vm0, %v1223_v23, 0.0 }
 0x2e3   :  { %1226 = vpow2.f32 %v617_v25 }
 0x2e8   :  { %v1225_v26 = vpop.eup %1224 }
 0x2e9   :  { %v642_v27 = vsel %vm227_vm0, %v1225_v26, 0.0  ;;  %v1227_v28 = vpop.eup %1226 }
 0x2ea   :  { %628 = vadd.xlane.f32.xlu2 %v627_v15  ;;  %v639_v29 = vsel %vm227_vm0, %v1227_v28, 0.0 }
 0x2f2   :  { %643 = vadd.xlane.f32.xlu2 %v642_v27 }
 0x2fa   :  { %640 = vadd.xlane.f32.xlu2 %v639_v29 }
 0x312   :  { %1198 = vrot.lane.b32.xlu2 %v1681_v11, %s1486_s7 }
 0x33c   :  { %v739_v37 = vpop.f32.mrf.mxu1 }
 0x345   :  { %v623_v13 = vpop.xlane.xlu2 %622 }
 0x346   :  { %1228 = vrcp.f32 %v623_v13 }
 0x34a   :  { %v770_v11 = vpop.f32.mrf.mxu2 }
 0x34c   :  { %v1229_v31 = vpop.eup %1228 }
 0x34d   :  { %v653_v32 = vmul.f32 %v1229_v31, %v1217_v3  ;;  %v635_v33 = vpop.xlane.xlu2 %634 }
 0x34e   :  { %1230 = vrcp.f32 %v635_v33 }
 0x34f   :  { %1141 = vmatmul.msk.f32.vlgmr.msrb.gmra.mxu0 %vm227_vm0, %v653_v32 }
 0x354   :  { %v1231_v34 = vpop.eup %1230 }
 0x355   :  { %v657_v35 = vmul.f32 %v1231_v34, %v1219_v10  ;;  %v632_v36 = vpop.xlane.xlu2 %631 }
 0x357   :  { %1142 = vmatmul.msk.f32.vlgmr.msrb.gmra.mxu3 %vm227_vm0, %v657_v35  ;;  %1145 = vmatmul.msk.f32.vlgmr.msra.gmra.mxu0 %vm322_vm2, %v739_v37 }
 0x358   :  { %999 = vmatpush.msrb.mxu3 %v664_v56 }
 0x35d   :  { %v629_v38 = vpop.xlane.xlu2 %628 }
 0x35e   :  { %1232 = vrcp.f32 %v629_v38 }
 0x35f   :  { %1146 = vmatmul.msk.f32.gmra.mxu0 %vm322_vm2, %v770_v11 }
 0x364   :  { %v1233_v39 = vpop.eup %1232 }
 0x365   :  { %v655_v40 = vmul.f32 %v1233_v39, %v1223_v23  ;;  %v644_v41 = vpop.xlane.xlu2 %643  ;;  %v1487_v23 = vmov 32.0  }
 0x367   :  { %1149 = vmatmul.msk.f32.vlgmr.msrb.gmra.mxu1 %vm227_vm0, %v655_v40 }
 0x36d   :  { %v641_v42 = vpop.xlane.xlu2 %640 }
 0x36e   :  { %1234 = vrcp.f32 %v641_v42 }
 0x36f   :  { %1236 = vrcp.f32 %v644_v41 }
 0x370   :  { %1238 = vrcp.f32 %v632_v36 }
 0x371   :  { %1240 = vrcp.f32 %v1487_v23 }
 0x374   :  { %v1235_v43 = vpop.eup %1234 }
 0x375   :  { %v659_v44 = vmul.f32 %v1235_v43, %v1227_v28  ;;  %v1199_v45 = vpop.permute.xlu2 %1198  ;;  %v1237_v46 = vpop.eup %1236 }
 0x376   :  { %v1200_v47 = vunpack.i.l.bf16 %v1199_v45  ;;  %v1201_v48 = vunpack.i.h.bf16 %v1199_v45  ;;  %v660_v49 = vmul.f32 %v1237_v46, %v1225_v26  ;;  %v1239_v50 = vpop.eup %1238 }
 0x377   :  { %1150 = vmatmul.msk.f32.vlgmr.msra.gmra.mxu2 %vm227_vm0, %v659_v44  ;;  %v656_v51 = vmul.f32 %v1239_v50, %v1221_v19  ;;  %v1241_v24 = vpop.eup %1240 }
 0x378   :  { %972 = vmatpush.msrb.mxu0 %v1200_v47  ;;  %v1024_v15 = vmul.f32 32.0, %v1241_v24  ;;  %vm1028_vm3 = vweird.f32 %v1241_v24 }
 0x37a   :  { %973 = vmatpush.msrb.mxu0 %v1201_v48  ;;  %v1025_v25 = vsub.f32 1.0, %v1024_v15 }
 0x37b   :  { %1154 = vmatmul.msk.f32.vlgmr.msrb.gmra.mxu0 %vm227_vm0, %v660_v49  ;;  %v1206_v49 = vld [vmem:[%s1765_s12] ss:$0 sm:$0xff]  ;;  %s1488_s12 = smov [#allocation16]  }
 0x37c   :  { %v1026_v26 = vmul.f32 %v1241_v24, %v1025_v25  ;;  %s1086_s2 = sshll.u32 %s1488_s12, 4  ;;  %s1087_s2 = int_to_ptr.vmem [resolvable:$true] %s1086_s2 }
 0x37e   :  { %v1027_v27 = vadd.f32 %v1241_v24, %v1026_v26 }
 0x37f   :  { %1153 = vmatmul.msk.f32.vlgmr.msrb.gmra.mxu2 %vm227_vm0, %v656_v51 }
 0x3cc   :  { %v685_v54 = vpop.f32.mrf.mxu0 }
 0x3cd   :  { %1147 = vmatmul.msk.f32.vlgmr.msra.gmra.mxu3 %vm322_vm2, %v685_v54 }
 0x3d4   :  { %v796_v58 = vpop.f32.mrf.mxu0 }
 0x3da   :  { %v708_v55 = vpop.f32.mrf.mxu3 }
 0x3db   :  { %1148 = vmatmul.msk.f32.gmra.mxu3 %vm322_vm2, %v708_v55 }
 0x3dc   :  { %v799_v60 = vpop.f32.mrf.mxu0 }
 0x3e4   :  { %v857_v57 = vpop.f32.mrf.mxu1 }
 0x3e5   :  { %1151 = vmatmul.msk.f32.vlgmr.msra.gmra.mxu1 %vm322_vm2, %v857_v57 }
 0x3f8   :  { %v975_v62 = vpop.f32.mrf.mxu0 }
 0x3fa   :  { %v886_v59 = vpop.f32.mrf.mxu2 }
 0x3fb   :  { %1152 = vmatmul.msk.f32.gmra.mxu1 %vm322_vm2, %v886_v59 }
 0x402   :  { %v946_v61 = vpop.f32.mrf.mxu2 }
 0x403   :  { %1155 = vmatmul.msk.f32.vlgmr.msrb.gmra.mxu3 %vm322_vm2, %v946_v61 }
 0x40b   :  { %1156 = vmatmul.msk.f32.gmra.mxu3 %vm322_vm2, %v975_v62 }
 0x450   :  { %v825_v63 = vpop.f32.mrf.mxu3 }
 0x451   :  { %v826_v2 = vadd.f32 %v825_v63, %v796_v58 }
 0x45e   :  { %v828_v0 = vpop.f32.mrf.mxu3 }
 0x45f   :  { %v829_v12 = vadd.f32 %v828_v0, %v799_v60 }
 0x462   :  { %v912_v1 = vpop.f32.mrf.mxu1 }
 0x463   :  { %v918_v3 = vadd.f32 %v912_v1, %v826_v2 }
 0x478   :  { %v915_v10 = vpop.f32.mrf.mxu1 }
 0x479   :  { %v919_v16 = vadd.f32 %v915_v10, %v829_v12 }
 0x486   :  { %v1001_v5 = vpop.f32.mrf.mxu3 }
 0x487   :  { %v1007_v6 = vadd.f32 %v1001_v5, %v918_v3 }
 0x489   :  { %v1013_v8 = vadd.f32 %v1205_v4, %v1007_v6 }
 0x48b   :  { %v1015_v14 = vadd.f32 %v1013_v8, %v1613_v7  ;;  %v1029_v7 = vsel %vm1028_vm3, %v1241_v24, %v1027_v27 }
 0x48d   :  { %v1017_v17 = vsel %vm191_vm1, %v1015_v14, 0.0 }
 0x48e   :  { %1018 = vadd.xlane.f32.xlu0 %v1017_v17  ;;  %v1004_v18 = vpop.f32.mrf.mxu3 }
 0x48f   :  { %v1008_v19 = vadd.f32 %v1004_v18, %v919_v16 }
 0x491   :  { %v1014_v20 = vadd.f32 %v1205_v4, %v1008_v19 }
 0x493   :  { %v1016_v21 = vadd.f32 %v1014_v20, %v1618_v9 }
 0x495   :  { %v1020_v22 = vsel %vm191_vm1, %v1016_v21, 0.0 }
 0x496   :  { %1021 = vadd.xlane.f32.xlu1 %v1020_v22 }
 0x501   :  { %v1019_v28 = vpop.xlane.xlu0 %1018 }
 0x502   :  { %v1030_v29 = vmul.f32 %v1029_v7, %v1019_v28 }
 0x504   :  { %v1032_v30 = vsub.f32 %v1015_v14, %v1030_v29 }
 0x506   :  { %v1034_v13 = vmul.f32 %v1032_v30, %v1032_v30 }
 0x508   :  { %v1036_v31 = vsel %vm191_vm1, %v1034_v13, 0.0 }
 0x509   :  { %1037 = vadd.xlane.f32.xlu2 %v1036_v31  ;;  %v1022_v9 = vpop.xlane.xlu1 %1021 }
 0x50a   :  { %v1031_v32 = vmul.f32 %v1029_v7, %v1022_v9 }
 0x50c   :  { %v1033_v33 = vsub.f32 %v1016_v21, %v1031_v32 }
 0x50e   :  { %v1035_v34 = vmul.f32 %v1033_v33, %v1033_v33 }
 0x510   :  { %v1039_v35 = vsel %vm191_vm1, %v1035_v34, 0.0 }
 0x511   :  { %1040 = vadd.xlane.f32.xlu0 %v1039_v35 }
 0x57c   :  { %v1038_v36 = vpop.xlane.xlu2 %1037 }
 0x57d   :  { %v1042_v37 = vmul.f32 %v1038_v36, %v1029_v7 }
 0x57f   :  { %v1044_v38 = vadd.f32 1e-12, %v1042_v37 }
 0x581   :  { %1242 = vrsqrt.f32 %v1044_v38  ;;  %vm1052_vm5 = vweird.f32 %v1044_v38 }
 0x584   :  { %v1041_v11 = vpop.xlane.xlu0 %1040 }
 0x585   :  { %v1043_v39 = vmul.f32 %v1041_v11, %v1029_v7 }
 0x587   :  { %v1243_v40 = vpop.eup %1242  ;;  %v1045_v41 = vadd.f32 1e-12, %v1043_v39 }
 0x588   :  { %v1047_v42 = vmul.f32 %v1243_v40, %v1044_v38  ;;  %vm1053_vm4 = vweird.f32 %v1243_v40 }
 0x589   :  { %1244 = vrsqrt.f32 %v1045_v41  ;;  %vm1054_vm6 = vmor %vm1052_vm5, %vm1053_vm4  ;;  %vm1062_vm8 = vweird.f32 %v1045_v41 }
 0x58a   :  { %v1048_v43 = vmul.f32 %v1243_v40, %v1047_v42 }
 0x58c   :  { %v1049_v44 = vmul.f32 0.5, %v1048_v43 }
 0x58e   :  { %v1050_v45 = vsub.f32 1.5, %v1049_v44 }
 0x58f   :  { %v1245_v46 = vpop.eup %1244 }
 0x590   :  { %v1051_v47 = vmul.f32 %v1243_v40, %v1050_v45  ;;  %v1057_v48 = vmul.f32 %v1245_v46, %v1045_v41  ;;  %vm1063_vm7 = vweird.f32 %v1245_v46 }
 0x591   :  { %vm1064_vm9 = vmor %vm1062_vm8, %vm1063_vm7 }
 0x592   :  { %v1055_v50 = vsel %vm1054_vm6, %v1243_v40, %v1051_v47  ;;  %v1058_v51 = vmul.f32 %v1245_v46, %v1057_v48 }
 0x593   :  { %v1066_v52 = vmul.f32 %v1055_v50, %v1032_v30 }
 0x594   :  { %v1059_v54 = vmul.f32 0.5, %v1058_v51 }
 0x595   :  { %v1072_v55 = vmul.f32 %v1206_v49, %v1066_v52 }
 0x596   :  { %v1060_v56 = vsub.f32 1.5, %v1059_v54 }
 0x597   :  { %v1078_v57 = vadd.f32 %v1207_v53, %v1072_v55 }
 0x598   :  { %v1061_v58 = vmul.f32 %v1245_v46, %v1060_v56 }
 0x599   :  { %1080 = vst.msk [vmem:[#allocation16] sm:$0xff] %vm191_vm1, %v1078_v57 }
 0x59a   :  { %v1065_v59 = vsel %vm1064_vm9, %v1245_v46, %v1061_v58 }
 0x59b   :  { %v1067_v60 = vmul.f32 %v1065_v59, %v1033_v33 }
 0x59d   :  { %v1073_v61 = vmul.f32 %v1206_v49, %v1067_v60 }
 0x59f   :  { %v1079_v62 = vadd.f32 %v1207_v53, %v1073_v61 }
 0x5a1   :  { %1081 = vst.msk [vmem:[#allocation16 + $0x8] sm:$0xff] %vm191_vm1, %v1079_v62 }
 0x5a2   :  { %1094 = dma.vmem_to_hbm [thread:$0]  %s1087_s2, 256, %s1089_s3, [#allocation4], %s1475_s21, %s1475_s21, %s1476_s22  }
 0x5a3   :  { %1472 = dma.done.wait [#allocation4], 256  }
 0x5a4   :  { %1473 = vsyncadd [#allocation4], 4294967040 }
 0x5a5   :  { %1099 = vsyncpa [#allocation3], 1 }
 0x5a6   :  { %1100 = vsyncpa [#allocation6], 1 }
 0x5a7   :  { %1101 = vsyncpa [#allocation9], 1 }
 0x5a8   :  { %1102 = vsyncpa [#allocation12], 1 }
 0x5a9   :  { %1103 = vsyncpa [#allocation15], 1 }
 0x5aa   :  { %1104 = vsyncpa [#allocation4], 1 }

</bundles_post_ra>
